<compile_context>
chip_gen: v7x
topology: tpu7x:2x2x1
jax: 0.10.0
libtpu: 0.0.40
codegen_flags: <defaults>
</compile_context>

<pallas_src>
import functools

import numpy as np
import jax
import jax.numpy as jnp
from jax import lax
from jax.experimental import pallas as pl
from jax.experimental.pallas import tpu as pltpu


def _round_up(x, m):
    return ((x + m - 1) // m) * m


# ----------------------------------------------------------------------------
# Kernel
#   xm_ref : (1, C_in, TL)        main window, lanes [t*TL, (t+1)*TL)
#   xh_ref : (1, C_in, HALO)      halo window, lanes [(t+1)*TL, (t+1)*TL+HALO)
#   w_ref  : (T, C_total, C_in)   T = 3*K per-(branch, tap) weights (zero rows
#                                 outside the branch's output-channel range)
#   b_ref  : (C_total, 1)
#   o_ref  : (1, C_total, TL)
#   out[:, l] = sum_tap w_ref[tap] @ x[:, l + offsets[tap]] + bias
# ----------------------------------------------------------------------------
def _fused_inception_kernel(xm_ref, xh_ref, w_ref, b_ref, o_ref, *, offsets, tl):
    x = jnp.concatenate([xm_ref[0], xh_ref[0]], axis=-1)     # (C_in, TL + HALO)
    c_total = o_ref.shape[1]
    acc = jnp.zeros((c_total, tl), dtype=jnp.float32)
    for idx, off in enumerate(offsets):                      # static, unrolled
        xs = x[:, off:off + tl]                              # static lane slice
        acc = acc + jnp.dot(w_ref[idx], xs,
                            preferred_element_type=jnp.float32)
    o_ref[0, :, :] = (acc + b_ref[...]).astype(o_ref.dtype)


def inception135_pallas(x_ncl, w_taps, b_col, *, offsets, kernel_size,
                        left_pad, tile_l=512):
    """x_ncl: (N, C_in, L); w_taps: (3K, C_total, C_in); b_col: (C_total, 1)."""
    n, c_in, l = x_ncl.shape
    t_taps, c_total, c_in_w = w_taps.shape
    assert c_in_w == c_in
    l_out = l - (kernel_size - 1)
    assert l_out > 0

    max_off = max(offsets)
    halo = max(128, _round_up(max_off, 128))           # halo block (lane mult. of 128)
    tl = min(tile_l, _round_up(l_out, 128))            # lane-dense output tile
    tl = _round_up(tl, halo)                           # so (t+1)*tl is halo-aligned
    num_tiles = pl.cdiv(l_out, tl)
    l_out_pad = num_tiles * tl                         # cropped back to l_out below
    l_in_pad = l_out_pad + halo
    right_pad = l_in_pad - left_pad - l
    assert right_pad >= 0

    # Single pad of x (covers all three branches' paddings + tile/halo slack).
    x_pad = jnp.pad(x_ncl, ((0, 0), (0, 0), (left_pad, right_pad)))

    halo_blocks_per_tile = tl // halo
    kern = functools.partial(_fused_inception_kernel,
                             offsets=tuple(int(o) for o in offsets), tl=tl)

    y = pl.pallas_call(
        kern,
        out_shape=jax.ShapeDtypeStruct((n, c_total, l_out_pad), x_ncl.dtype),
        grid=(n, num_tiles),
        in_specs=[
            # main L tile of x
            pl.BlockSpec((1, c_in, tl), lambda i, t: (i, 0, t)),
            # halo: the next `halo` lanes after the main tile (same array)
            pl.BlockSpec((1, c_in, halo),
                         lambda i, t: (i, 0, (t + 1) * halo_blocks_per_tile)),
            # combined weights / bias: constant across the grid (fetched once)
            pl.BlockSpec((t_taps, c_total, c_in), lambda i, t: (0, 0, 0)),
            pl.BlockSpec((c_total, 1), lambda i, t: (0, 0)),
        ],
        out_specs=pl.BlockSpec((1, c_total, tl), lambda i, t: (i, 0, t)),
        compiler_params=pltpu.CompilerParams(
            dimension_semantics=("parallel", "parallel"),
            vmem_limit_bytes=32 * 1024 * 1024,
        ),
    )(x_pad, x_pad, w_taps, b_col)

    return y[:, :, :l_out]                              # crop padded tail


# ----------------------------------------------------------------------------
# Module wrapper (matches PyTorch Inception135 semantics)
# ----------------------------------------------------------------------------
class Inception135Pallas:
    DILATIONS = (1, 3, 5)

    def __init__(self, in_c, c1, c2, c3, kernel, key):
        self.in_c, self.kernel = in_c, kernel
        self.c_outs = (c1, c2, c3)
        self.paddings = (0, kernel - 1, 2 * (kernel - 1))
        self.max_pad = max(self.paddings)
        self.c_total = c1 + c2 + c3

        keys = jax.random.split(key, 2 * len(self.c_outs))
        bound = 1.0 / np.sqrt(in_c * kernel)            # PyTorch Conv1d init scale
        self.w_oik, self.biases = [], []
        for bi, c_out in enumerate(self.c_outs):
            wk, bk = keys[2 * bi], keys[2 * bi + 1]
            w = jax.random.uniform(wk, (c_out, in_c, kernel), jnp.float32,
                                   -bound, bound)       # PyTorch layout (O, I, K)
            b = jax.random.uniform(bk, (c_out,), jnp.float32, -bound, bound)
            self.w_oik.append(w)
            self.biases.append(b)

        # Fused per-(branch, tap) weights + static tap offsets into the
        # max-padded input.
        w_taps = np.zeros((len(self.c_outs) * kernel, self.c_total, in_c),
                          np.float32)
        offsets = []
        row = 0
        for bi, c_out in enumerate(self.c_outs):
            d = self.DILATIONS[bi]
            base = self.max_pad - self.paddings[bi]
            wb = np.asarray(self.w_oik[bi])             # (c_out, in_c, K)
            for j in range(kernel):
                w_taps[bi * kernel + j, row:row + c_out, :] = wb[:, :, j]
                offsets.append(base + j * d)
            row += c_out
        self.w_taps = jnp.asarray(w_taps)               # (3K, C_total, C_in)
        self.bias_col = jnp.concatenate(self.biases)[:, None]  # (C_total, 1)
        self.offsets = tuple(int(o) for o in offsets)

    def __call__(self, x_ncl):
        n, c_in, l = x_ncl.shape
        assert c_in == self.in_c
        return inception135_pallas(
            x_ncl, self.w_taps, self.bias_col,
            offsets=self.offsets, kernel_size=self.kernel,
            left_pad=self.max_pad)

    # pure-JAX reference (lax conv) for correctness checking
    def reference(self, x_ncl):
        outs = []
        for bi, c_out in enumerate(self.c_outs):
            y = lax.conv_general_dilated(
                x_ncl, self.w_oik[bi],
                window_strides=(1,),
                padding=[(self.paddings[bi], self.paddings[bi])],
                rhs_dilation=(self.DILATIONS[bi],),
                dimension_numbers=("NCH", "OIH", "NCH"))
            outs.append(y + self.biases[bi][None, :, None])
        return jnp.concatenate(outs, axis=1)


if __name__ == "__main__":
    key = jax.random.PRNGKey(0)
    k_x, k_p = jax.random.split(key)

    N, IN_C, L = 2, 4, 16
    C1, C2, C3, K = 3, 5, 6, 3

    x = jax.random.normal(k_x, (N, IN_C, L), dtype=jnp.float32)

    model = Inception135Pallas(IN_C, C1, C2, C3, K, k_p)

    out = jax.block_until_ready(model(x))
    ref = jax.block_until_ready(model.reference(x))

    assert out.shape == (N, C1 + C2 + C3, L - (K - 1)), out.shape
    np.testing.assert_allclose(np.asarray(out), np.asarray(ref),
                               rtol=1e-5, atol=1e-5)

    print("KERNEL_OK")
</pallas_src>

<mosaic_0001>
module attributes {stable_mosaic.version = 11 : i64} {
  func.func @_fused_inception_kernel(%arg0: i32, %arg1: i32, %arg2: memref<1x4x128xf32, #tpu.memory_space<vmem>>, %arg3: memref<1x4x128xf32, #tpu.memory_space<vmem>>, %arg4: memref<9x14x4xf32, #tpu.memory_space<vmem>>, %arg5: memref<14x1xf32, #tpu.memory_space<vmem>>, %arg6: memref<1x14x128xf32, #tpu.memory_space<vmem>>) attributes {dimension_semantics = [#tpu.dimension_semantics<parallel>, #tpu.dimension_semantics<parallel>], iteration_bounds = array<i64: 2, 1>, scalar_prefetch = 0 : i64, scratch_operands = 0 : i64, tpu.core_type = #tpu.core_type<tc>, window_params = [{transform_indices = @transform_0, window_bounds = array<i64: 1, 4, 128>}, {transform_indices = @transform_1, window_bounds = array<i64: 1, 4, 128>}, {pipeline_mode = #tpu.pipeline_mode<synchronous>, transform_indices = @transform_2, window_bounds = array<i64: 9, 14, 4>}, {pipeline_mode = #tpu.pipeline_mode<synchronous>, transform_indices = @transform_3, window_bounds = array<i64: 14, 1>}, {transform_indices = @transform_4, window_bounds = array<i64: 1, 14, 128>}]} {
    %c0 = arith.constant 0 : index
    %c0_0 = arith.constant 0 : index
    %c0_1 = arith.constant 0 : index
    %0 = vector.load %arg2[%c0, %c0_0, %c0_1] : memref<1x4x128xf32, #tpu.memory_space<vmem>>, vector<1x4x128xf32>
    %1 = vector.shape_cast %0 : vector<1x4x128xf32> to vector<4x128xf32>
    %c0_2 = arith.constant 0 : index
    %c0_3 = arith.constant 0 : index
    %c0_4 = arith.constant 0 : index
    %2 = vector.load %arg3[%c0_2, %c0_3, %c0_4] : memref<1x4x128xf32, #tpu.memory_space<vmem>>, vector<1x4x128xf32>
    %3 = vector.shape_cast %2 : vector<1x4x128xf32> to vector<4x128xf32>
    %4 = tpu.concatenate %1, %3 in 1 : vector<4x128xf32>, vector<4x128xf32> -> vector<4x256xf32>
    %cst = arith.constant 0.000000e+00 : f32
    %5 = vector.broadcast %cst : f32 to vector<14x128xf32>
    %6 = vector.extract_strided_slice %4 {offsets = [0, 4], sizes = [4, 128], strides = [1, 1]} : vector<4x256xf32> to vector<4x128xf32>
    %c0_5 = arith.constant 0 : index
    %c0_6 = arith.constant 0 : index
    %c0_7 = arith.constant 0 : index
    %7 = vector.load %arg4[%c0_5, %c0_6, %c0_7] : memref<9x14x4xf32, #tpu.memory_space<vmem>>, vector<1x14x4xf32>
    %8 = vector.shape_cast %7 : vector<1x14x4xf32> to vector<14x4xf32>
    %cst_8 = arith.constant dense<0.000000e+00> : vector<14x128xf32>
    %9 = tpu.matmul %8, %6, %cst_8 {dimension_numbers = #tpu.dot_dimension_numbers<[1], [0], [0], [1], [0, 0, 1, 1], [], []>} : vector<14x4xf32>, vector<4x128xf32>, vector<14x128xf32> -> vector<14x128xf32>
    %10 = arith.addf %5, %9 : vector<14x128xf32>
    %11 = vector.extract_strided_slice %4 {offsets = [0, 5], sizes = [4, 128], strides = [1, 1]} : vector<4x256xf32> to vector<4x128xf32>
    %c1 = arith.constant 1 : index
    %c0_9 = arith.constant 0 : index
    %c0_10 = arith.constant 0 : index
    %12 = vector.load %arg4[%c1, %c0_9, %c0_10] : memref<9x14x4xf32, #tpu.memory_space<vmem>>, vector<1x14x4xf32>
    %13 = vector.shape_cast %12 : vector<1x14x4xf32> to vector<14x4xf32>
    %cst_11 = arith.constant dense<0.000000e+00> : vector<14x128xf32>
    %14 = tpu.matmul %13, %11, %cst_11 {dimension_numbers = #tpu.dot_dimension_numbers<[1], [0], [0], [1], [0, 0, 1, 1], [], []>} : vector<14x4xf32>, vector<4x128xf32>, vector<14x128xf32> -> vector<14x128xf32>
    %15 = arith.addf %10, %14 : vector<14x128xf32>
    %16 = vector.extract_strided_slice %4 {offsets = [0, 6], sizes = [4, 128], strides = [1, 1]} : vector<4x256xf32> to vector<4x128xf32>
    %c2 = arith.constant 2 : index
    %c0_12 = arith.constant 0 : index
    %c0_13 = arith.constant 0 : index
    %17 = vector.load %arg4[%c2, %c0_12, %c0_13] : memref<9x14x4xf32, #tpu.memory_space<vmem>>, vector<1x14x4xf32>
    %18 = vector.shape_cast %17 : vector<1x14x4xf32> to vector<14x4xf32>
    %cst_14 = arith.constant dense<0.000000e+00> : vector<14x128xf32>
    %19 = tpu.matmul %18, %16, %cst_14 {dimension_numbers = #tpu.dot_dimension_numbers<[1], [0], [0], [1], [0, 0, 1, 1], [], []>} : vector<14x4xf32>, vector<4x128xf32>, vector<14x128xf32> -> vector<14x128xf32>
    %20 = arith.addf %15, %19 : vector<14x128xf32>
    %21 = vector.extract_strided_slice %4 {offsets = [0, 2], sizes = [4, 128], strides = [1, 1]} : vector<4x256xf32> to vector<4x128xf32>
    %c3 = arith.constant 3 : index
    %c0_15 = arith.constant 0 : index
    %c0_16 = arith.constant 0 : index
    %22 = vector.load %arg4[%c3, %c0_15, %c0_16] : memref<9x14x4xf32, #tpu.memory_space<vmem>>, vector<1x14x4xf32>
    %23 = vector.shape_cast %22 : vector<1x14x4xf32> to vector<14x4xf32>
    %cst_17 = arith.constant dense<0.000000e+00> : vector<14x128xf32>
    %24 = tpu.matmul %23, %21, %cst_17 {dimension_numbers = #tpu.dot_dimension_numbers<[1], [0], [0], [1], [0, 0, 1, 1], [], []>} : vector<14x4xf32>, vector<4x128xf32>, vector<14x128xf32> -> vector<14x128xf32>
    %25 = arith.addf %20, %24 : vector<14x128xf32>
    %26 = vector.extract_strided_slice %4 {offsets = [0, 5], sizes = [4, 128], strides = [1, 1]} : vector<4x256xf32> to vector<4x128xf32>
    %c4 = arith.constant 4 : index
    %c0_18 = arith.constant 0 : index
    %c0_19 = arith.constant 0 : index
    %27 = vector.load %arg4[%c4, %c0_18, %c0_19] : memref<9x14x4xf32, #tpu.memory_space<vmem>>, vector<1x14x4xf32>
    %28 = vector.shape_cast %27 : vector<1x14x4xf32> to vector<14x4xf32>
    %cst_20 = arith.constant dense<0.000000e+00> : vector<14x128xf32>
    %29 = tpu.matmul %28, %26, %cst_20 {dimension_numbers = #tpu.dot_dimension_numbers<[1], [0], [0], [1], [0, 0, 1, 1], [], []>} : vector<14x4xf32>, vector<4x128xf32>, vector<14x128xf32> -> vector<14x128xf32>
    %30 = arith.addf %25, %29 : vector<14x128xf32>
    %31 = vector.extract_strided_slice %4 {offsets = [0, 8], sizes = [4, 128], strides = [1, 1]} : vector<4x256xf32> to vector<4x128xf32>
    %c5 = arith.constant 5 : index
    %c0_21 = arith.constant 0 : index
    %c0_22 = arith.constant 0 : index
    %32 = vector.load %arg4[%c5, %c0_21, %c0_22] : memref<9x14x4xf32, #tpu.memory_space<vmem>>, vector<1x14x4xf32>
    %33 = vector.shape_cast %32 : vector<1x14x4xf32> to vector<14x4xf32>
    %cst_23 = arith.constant dense<0.000000e+00> : vector<14x128xf32>
    %34 = tpu.matmul %33, %31, %cst_23 {dimension_numbers = #tpu.dot_dimension_numbers<[1], [0], [0], [1], [0, 0, 1, 1], [], []>} : vector<14x4xf32>, vector<4x128xf32>, vector<14x128xf32> -> vector<14x128xf32>
    %35 = arith.addf %30, %34 : vector<14x128xf32>
    %36 = vector.extract_strided_slice %4 {offsets = [0, 0], sizes = [4, 128], strides = [1, 1]} : vector<4x256xf32> to vector<4x128xf32>
    %c6 = arith.constant 6 : index
    %c0_24 = arith.constant 0 : index
    %c0_25 = arith.constant 0 : index
    %37 = vector.load %arg4[%c6, %c0_24, %c0_25] : memref<9x14x4xf32, #tpu.memory_space<vmem>>, vector<1x14x4xf32>
    %38 = vector.shape_cast %37 : vector<1x14x4xf32> to vector<14x4xf32>
    %cst_26 = arith.constant dense<0.000000e+00> : vector<14x128xf32>
    %39 = tpu.matmul %38, %36, %cst_26 {dimension_numbers = #tpu.dot_dimension_numbers<[1], [0], [0], [1], [0, 0, 1, 1], [], []>} : vector<14x4xf32>, vector<4x128xf32>, vector<14x128xf32> -> vector<14x128xf32>
    %40 = arith.addf %35, %39 : vector<14x128xf32>
    %41 = vector.extract_strided_slice %4 {offsets = [0, 5], sizes = [4, 128], strides = [1, 1]} : vector<4x256xf32> to vector<4x128xf32>
    %c7 = arith.constant 7 : index
    %c0_27 = arith.constant 0 : index
    %c0_28 = arith.constant 0 : index
    %42 = vector.load %arg4[%c7, %c0_27, %c0_28] : memref<9x14x4xf32, #tpu.memory_space<vmem>>, vector<1x14x4xf32>
    %43 = vector.shape_cast %42 : vector<1x14x4xf32> to vector<14x4xf32>
    %cst_29 = arith.constant dense<0.000000e+00> : vector<14x128xf32>
    %44 = tpu.matmul %43, %41, %cst_29 {dimension_numbers = #tpu.dot_dimension_numbers<[1], [0], [0], [1], [0, 0, 1, 1], [], []>} : vector<14x4xf32>, vector<4x128xf32>, vector<14x128xf32> -> vector<14x128xf32>
    %45 = arith.addf %40, %44 : vector<14x128xf32>
    %46 = vector.extract_strided_slice %4 {offsets = [0, 10], sizes = [4, 128], strides = [1, 1]} : vector<4x256xf32> to vector<4x128xf32>
    %c8 = arith.constant 8 : index
    %c0_30 = arith.constant 0 : index
    %c0_31 = arith.constant 0 : index
    %47 = vector.load %arg4[%c8, %c0_30, %c0_31] : memref<9x14x4xf32, #tpu.memory_space<vmem>>, vector<1x14x4xf32>
    %48 = vector.shape_cast %47 : vector<1x14x4xf32> to vector<14x4xf32>
    %cst_32 = arith.constant dense<0.000000e+00> : vector<14x128xf32>
    %49 = tpu.matmul %48, %46, %cst_32 {dimension_numbers = #tpu.dot_dimension_numbers<[1], [0], [0], [1], [0, 0, 1, 1], [], []>} : vector<14x4xf32>, vector<4x128xf32>, vector<14x128xf32> -> vector<14x128xf32>
    %50 = arith.addf %45, %49 : vector<14x128xf32>
    %c0_33 = arith.constant 0 : index
    %c0_34 = arith.constant 0 : index
    %51 = vector.load %arg5[%c0_33, %c0_34] : memref<14x1xf32, #tpu.memory_space<vmem>>, vector<14x1xf32>
    %52 = vector.broadcast %51 : vector<14x1xf32> to vector<14x128xf32>
    %53 = arith.addf %50, %52 : vector<14x128xf32>
    %c0_35 = arith.constant 0 : index
    %c0_36 = arith.constant 0 : index
    %c0_37 = arith.constant 0 : index
    %54 = vector.load %arg6[%c0_35, %c0_36, %c0_37] : memref<1x14x128xf32, #tpu.memory_space<vmem>>, vector<1x14x128xf32>
    %55 = vector.shape_cast %54 : vector<1x14x128xf32> to vector<14x128xf32>
    %56 = vector.shape_cast %53 : vector<14x128xf32> to vector<1x14x128xf32>
    tpu.vector_store %arg6[%c0_35, %c0_36, %c0_37], %56 {strides = array<i32>} : memref<1x14x128xf32, #tpu.memory_space<vmem>>, vector<1x14x128xf32>,
    return
  }
  func.func @transform_0(%arg0: i32, %arg1: i32) -> (i32, i32, i32) {
    %c0_i32 = arith.constant 0 : i32
    %c0_i32_0 = arith.constant 0 : i32
    return %arg0, %c0_i32, %arg1 : i32, i32, i32
  }
  func.func @transform_1(%arg0: i32, %arg1: i32) -> (i32, i32, i32) {
    %c1_i32 = arith.constant 1 : i32
    %0 = arith.addi %arg1, %c1_i32 : i32
    %c1_i32_0 = arith.constant 1 : i32
    %1 = arith.muli %0, %c1_i32_0 : i32
    %c0_i32 = arith.constant 0 : i32
    %c0_i32_1 = arith.constant 0 : i32
    return %arg0, %c0_i32, %1 : i32, i32, i32
  }
  func.func @transform_2(%arg0: i32, %arg1: i32) -> (i32, i32, i32) {
    %c0_i32 = arith.constant 0 : i32
    %c0_i32_0 = arith.constant 0 : i32
    %c0_i32_1 = arith.constant 0 : i32
    %c0_i32_2 = arith.constant 0 : i32
    return %c0_i32, %c0_i32_0, %c0_i32_1 : i32, i32, i32
  }
  func.func @transform_3(%arg0: i32, %arg1: i32) -> (i32, i32) {
    %c0_i32 = arith.constant 0 : i32
    %c0_i32_0 = arith.constant 0 : i32
    %c0_i32_1 = arith.constant 0 : i32
    return %c0_i32, %c0_i32_0 : i32, i32
  }
  func.func @transform_4(%arg0: i32, %arg1: i32) -> (i32, i32, i32) {
    %c0_i32 = arith.constant 0 : i32
    %c0_i32_0 = arith.constant 0 : i32
    return %arg0, %c0_i32, %arg1 : i32, i32, i32
  }
}

</mosaic_0001>

<bundles_post_ra>
// kernel: tpu_custom_call.1
= control target key start
LH: loop header
LB: loop body
LE: loop exit
PB: predicated region body
PF: predicated region fallthrough
CT: control target
= control target key end

     0   :  { %s1447_s15 = smov 0   ;;  %s1449_s16 = smov 0   ;;  %s1593_s0 = inlined_call_operand.vmem [shape: f32[2,4,256], index: 0, kind: input, shape index: {}]   ;;  %s1594_s1 = inlined_call_operand.vmem [shape: f32[2,4,256], index: 1, kind: input, shape index: {}]   ;;  %s1595_s2 = inlined_call_operand.vmem [shape: f32[9,14,4], index: 2, kind: input, shape index: {}]   ;;  %s1596_s3 = inlined_call_operand.vmem [shape: f32[14,1], index: 3, kind: input, shape index: {}]   ;;  %s1597_s4 = inlined_call_operand.vmem [shape: f32[2,14,128], index: 4, kind: output, shape index: {}]  }
   0x1   :  { %s1451_s17 = smov 0  }
   0x2 LB: > { %s26_s18 = sadd.s32 1, %s1409_s16  ;;  %p1213_p0 = scmp.ge.s32.totalorder %s1413_s17, 1  ;;  %s1413_s17 = sphi %s1451_s17, %s14_s17   ;;  %s1409_s16 = sphi %s1449_s16, %s1599_s16   ;;  %s1405_s15 = sphi %s1447_s15, %s1598_s15  }
   0x3   : > { %p28_p1 = scmp.ge.s32.totalorder %s26_s18, 2  ;;  %p200_p2 = scmp.lt.s32.totalorder %s1413_s17, 3 }
   0x5   : > { %s1601_s18 = smov (%p28_p1, %s26_s18), 0  ;;  %p201_p3 = pnand %p1213_p0, %p200_p2 }
   0x6   : > { %p241_p4 = scmp.lt.s32.totalorder (!%p201_p3), %s1405_s15, 1  ;;  %v1220_v0 = vld [vmem:[%s1595_s2 + $0x10] sm:$0xff] (!%p201_p3)  ;;  %vm282_vm0 = vcmask (!%p201_p3), 31744   ;;  %v1238_v1 = vld [vmem:[%s1595_s2 + $0x40] sm:$0xff] (!%p201_p3)  ;;  %s1415_s5 = smov (!%p201_p3), 120   ;;  %v1421_v6 = vmov (!%p201_p3), 0  }
   0x7   : > { %204 = sbr.rel (%p201_p3) target bundleno = 390 (0x186), region = 36  ;;  %1299 = vmatprep.mubr.msk.f32.mxu1 (!%p201_p3), %vm282_vm0, %v1220_v0  ;;  %1319 = vmatprep.mubr.msk.f32.mxu0 (!%p201_p3), %vm282_vm0, %v1238_v1  ;;  %s1416_s6 = smov (!%p201_p3), 123   ;;  %v1093_v4 = vld [vmem:[%s1596_s3 + $0x8] sm:$0x3f] (!%p201_p3)  ;;  %v1092_v5 = vld [vmem:[%s1596_s3] sm:$0xff] (!%p201_p3)  ;;  %vm280_vm1 = vcmask (!%p201_p3), 1006592  }
   0x8   : > { %s1417_s7 = smov (!%p201_p3), 124   ;;  %s1418_s8 = smov (!%p201_p3), 122   ;;  %1390 = vset.pattern.permute.xlu1 (!%p201_p3), %v1421_v6  ;;  %1389 = vset.pattern.permute.xlu0 (!%p201_p3), %v1421_v6  ;;  %vm737_vm2 = vcmask (!%p201_p3), 982016   ;;  %vm289_vm3 = vcmask (!%p201_p3), 1043456   ;;  %v1221_v12 = vld [vmem:[%s1595_s2 + $0x18] sm:$0x3f] (!%p201_p3) }
   0x9   : > { %s1419_s9 = smov (!%p201_p3), 126   ;;  %s1420_s10 = smov (!%p201_p3), 118   ;;  %v1239_v13 = vld [vmem:[%s1595_s2 + $0x48] sm:$0x3f] (!%p201_p3)  ;;  %vm371_vm4 = vcmask (!%p201_p3), 1014784   ;;  %v269_v15 = vld [vmem:[%s1595_s2] sm:$0xff] (!%p201_p3) }
   0xa   : > { %v1243_v18 = vld [vmem:[%s1595_s2 + $0x50] sm:$0xff] (!%p201_p3)  ;;  %vm463_vm5 = vcmask (!%p201_p3), 998400   ;;  %v270_v22 = vld [vmem:[%s1595_s2 + $0x8] sm:$0x3f] (!%p201_p3)  ;;  %v1244_v23 = vld [vmem:[%s1595_s2 + $0x58] sm:$0x3f] (!%p201_p3) }
   0xb   : > { %vm557_vm6 = vcmask (!%p201_p3), 1031168   ;;  %v1228_v25 = vld [vmem:[%s1595_s2 + $0x20] sm:$0xff] (!%p201_p3)  ;;  %v1229_v30 = vld [vmem:[%s1595_s2 + $0x28] sm:$0x3f] (!%p201_p3)  ;;  %vm1005_vm7 = vcmask (!%p201_p3), 965632   ;;  %v1233_v34 = vld [vmem:[%s1595_s2 + $0x30] sm:$0xff] (!%p201_p3) }
   0xc   : > { %v1248_v26 = vld [vmem:[%s1595_s2 + $0x60] sm:$0xff] (!%p201_p3)  ;;  %v1249_v31 = vld [vmem:[%s1595_s2 + $0x68] sm:$0x3f] (!%p201_p3)  ;;  %v1253_v35 = vld [vmem:[%s1595_s2 + $0x70] sm:$0xff] (!%p201_p3) }
   0xd   : > { %v1234_v37 = vld [vmem:[%s1595_s2 + $0x38] sm:$0x3f] (!%p201_p3)  ;;  %v1258_v39 = vld [vmem:[%s1595_s2 + $0x80] sm:$0xff] (!%p201_p3)  ;;  %v1259_v40 = vld [vmem:[%s1595_s2 + $0x88] sm:$0x3f] (!%p201_p3) }
   0xe   : > { %s1603_s15 = smov (!%p241_p4, %s1405_s15), 1  ;;  %v1254_v38 = vld [vmem:[%s1595_s2 + $0x78] sm:$0x3f] }
   0xf   : > { %s1265_s23 = sshll.u32 %s1603_s15, 3  ;;  %s1268_s29 = sshll.u32 %s1603_s15, 4 }
  0x10   : > { %s248_s26 = scalar_lea.vmem %s1593_s0, %s1265_s23  ;;  %s1267_s27 = sadd.s32 4, %s1265_s23 }
  0x11   : > { %v1479_v2 = vld [vmem:[%s248_s26] sm:$0xf]  ;;  %s257_s30 = scalar_lea.vmem %s1594_s1, %s1267_s27 }
  0x12   : > { %733 = vrot.lane.b32.xlu1 %v1479_v2, %s1415_s5  ;;  %276 = vrot.lane.b32.xlu0 %v1479_v2, %s1416_s6  ;;  %v268_v3 = vld [vmem:[%s257_s30] sm:$0xf] }
  0x16   : > { %735 = vrot.lane.b32.xlu1 %v268_v3, %s1415_s5  ;;  %278 = vrot.lane.b32.xlu0 %v268_v3, %s1416_s6  ;;  %s266_s6 = scalar_lea.vmem %s1597_s4, %s1268_s29 }
  0x1a   : > { %369 = vrot.lane.b32.xlu1 %v268_v3, %s1417_s7  ;;  %367 = vrot.lane.b32.xlu0 %v1479_v2, %s1417_s7 }
  0x1e   : > { %461 = vrot.lane.b32.xlu1 %v268_v3, %s1418_s8  ;;  %459 = vrot.lane.b32.xlu0 %v1479_v2, %s1418_s8 }
  0x22   : > { %555 = vrot.lane.b32.xlu1 %v268_v3, %s1419_s9  ;;  %553 = vrot.lane.b32.xlu0 %v1479_v2, %s1419_s9 }
  0x26   : > { %1003 = vrot.lane.b32.xlu1 %v268_v3, %s1420_s10  ;;  %1001 = vrot.lane.b32.xlu0 %v1479_v2, %s1420_s10 }
  0x2a   : > { %1101 = vperm.xlu1 %1390, %v1093_v4   ;;  %1096 = vperm.xlu0 %1389, %v1092_v5  }
  0x84   : > { %v734_v7 = vpop.permute.xlu1 %733  ;;  %v277_v8 = vpop.permute.xlu0 %276 }
  0x88   : > { %v736_v9 = vpop.permute.xlu1 %735  ;;  %v279_v10 = vpop.permute.xlu0 %278 }
  0x89   : > { %v281_v11 = vsel %vm280_vm1, %v277_v8, %v279_v10  ;;  %v738_v14 = vsel %vm737_vm2, %v734_v7, %v736_v9 }
  0x8a   : > { %1297 = vmatprep.subr.msk.mxu1 %vm289_vm3, %v281_v11  ;;  %1317 = vmatprep.subr.msk.mxu0 %vm289_vm3, %v281_v11 }
  0x8b   : > { %1298 = vmatpush3.msk.msra.mxu1 %vm289_vm3, %v281_v11  ;;  %1318 = vmatpush3.msk.msra.mxu0 %vm289_vm3, %v281_v11 }
  0x8c   : > { %1300 = vmatmul.mubr.msk.f32.vlgmr.msra.gmra.mrb[0].mxu1 %vm282_vm0, %v1221_v12  ;;  %1320 = vmatmul.mubr.msk.f32.vlgmr.msra.gmra.mrb[0].mxu0 %vm282_vm0, %v1239_v13  ;;  %v370_v16 = vpop.permute.xlu1 %369  ;;  %v368_v17 = vpop.permute.xlu0 %367 }
  0x8d   : > { %1322 = vmatprep.subr.msk.mxu0 %vm289_vm3, %v738_v14  ;;  %v372_v19 = vsel %vm371_vm4, %v368_v17, %v370_v16  ;;  %1304 = vmatprep.mubr.msk.f32.mxu1 %vm282_vm0, %v269_v15 }
  0x8e   : > { %1323 = vmatpush3.msk.msra.mxu0 %vm289_vm3, %v738_v14  ;;  %1302 = vmatprep.subr.msk.mxu1 %vm289_vm3, %v372_v19 }
  0x8f   : > { %1303 = vmatpush3.msk.msra.mxu1 %vm289_vm3, %v372_v19  ;;  %1324 = vmatprep.mubr.msk.f32.mxu0 %vm282_vm0, %v1243_v18 }
  0x90   : > { %1327 = vmatprep.subr.msk.mxu0 %vm289_vm3, %v1479_v2  ;;  %v462_v20 = vpop.permute.xlu1 %461  ;;  %v460_v21 = vpop.permute.xlu0 %459 }
  0x91   : > { %v464_v24 = vsel %vm463_vm5, %v460_v21, %v462_v20 }
  0x92   : > { %1307 = vmatprep.subr.msk.mxu1 %vm289_vm3, %v464_v24 }
  0x94   : > { %1305 = vmatmul.mubr.msk.f32.vlgmr.msra.gmra.mrb[0].mxu1 %vm282_vm0, %v270_v22  ;;  %1325 = vmatmul.mubr.msk.f32.vlgmr.msra.gmra.mrb[0].mxu0 %vm282_vm0, %v1244_v23  ;;  %v556_v27 = vpop.permute.xlu1 %555  ;;  %v554_v28 = vpop.permute.xlu0 %553 }
  0x95   : > { %1328 = vmatpush3.msk.msra.mxu0 %vm289_vm3, %v1479_v2  ;;  %1308 = vmatpush3.msk.msra.mxu1 %vm289_vm3, %v464_v24  ;;  %v558_v29 = vsel %vm557_vm6, %v554_v28, %v556_v27 }
  0x96   : > { %1332 = vmatprep.subr.msk.mxu0 %vm289_vm3, %v281_v11  ;;  %1309 = vmatprep.mubr.msk.f32.mxu1 %vm282_vm0, %v1228_v25 }
  0x97   : > { %1329 = vmatprep.mubr.msk.f32.mxu0 %vm282_vm0, %v1248_v26  ;;  %1312 = vmatprep.subr.msk.mxu1 %vm289_vm3, %v558_v29 }
  0x98   : > { %v1004_v32 = vpop.permute.xlu1 %1003  ;;  %v1002_v33 = vpop.permute.xlu0 %1001 }
  0x99   : > { %v1006_v36 = vsel %vm1005_vm7, %v1002_v33, %v1004_v32 }
  0x9c   : > { %1310 = vmatmul.mubr.msk.f32.vlgmr.msra.gmra.mrb[0].mxu1 %vm282_vm0, %v1229_v30  ;;  %1330 = vmatmul.mubr.msk.f32.vlgmr.msra.gmra.mrb[0].mxu0 %vm282_vm0, %v1249_v31 }
  0x9d   : > { %1333 = vmatpush3.msk.msra.mxu0 %vm289_vm3, %v281_v11  ;;  %1313 = vmatpush3.msk.msra.mxu1 %vm289_vm3, %v558_v29 }
  0x9e   : > { %1314 = vmatprep.mubr.msk.f32.mxu1 %vm282_vm0, %v1233_v34  ;;  %1334 = vmatprep.mubr.msk.f32.mxu0 %vm282_vm0, %v1253_v35 }
  0x9f   : > { %1337 = vmatprep.subr.msk.mxu0 %vm289_vm3, %v1006_v36 }
  0xa4   : > { %1315 = vmatmul.mubr.msk.f32.vlgmr.msra.gmra.mrb[0].mxu1 %vm282_vm0, %v1234_v37  ;;  %1335 = vmatmul.mubr.msk.f32.vlgmr.msra.gmra.mrb[0].mxu0 %vm282_vm0, %v1254_v38 }
  0xa5   : > { %1338 = vmatpush3.msk.msra.mxu0 %vm289_vm3, %v1006_v36  ;;  %1339 = vmatprep.mubr.msk.f32.mxu0 %vm282_vm0, %v1258_v39 }
  0xa9   : > { %v1102_v44 = vpop.permute.xlu1 %1101  ;;  %v1097_v47 = vpop.permute.xlu0 %1096 }
  0xac   : > { %1340 = vmatmul.mubr.msk.f32.vlgmr.msra.gmra.mrb[0].mxu0 %vm282_vm0, %v1259_v40 }
 0x177   : > { %v1316_v41 = vpop.f32.mrb[0].mxu1 }
 0x178   : > { %v633_v42 = vpop.f32.mrb[1].mxu1 }
 0x17f   : > { %v1341_v43 = vpop.f32.mrb[0].mxu0 }
 0x180   : > { %v1342_v45 = vadd.f32 %v1341_v43, %v1316_v41  ;;  %v1081_v46 = vpop.f32.mrb[1].mxu0 }
 0x181   : > { %v1343_v48 = vadd.f32 %v1081_v46, %v633_v42 }
 0x182   : > { %v1105_v49 = vadd.f32 %v1342_v45, %v1102_v44 }
 0x183   : > { %v1104_v50 = vadd.f32 %v1343_v48, %v1097_v47 }
 0x184   : > { %1107 = vst [vmem:[%s266_s6 + $0x8] sm:$0x3f] %v1105_v49 }
 0x185   : > { %1106 = vst [vmem:[%s266_s6] sm:$0xff] %v1104_v50 }
 0x186 PF: > { %s14_s17 = sadd.s32 1, %s1413_s17   ;;  %s1598_s15 = smov %s1409_s16 }
 0x187   : > { %p11_p5 = scmp.ge.s32.totalorder %s14_s17, 4   ;;  %s1599_s16 = smov %s1601_s18 }
 0x189   :  { %13 = sbr.rel (!%p11_p5) target bundleno = 2 (0x2), region = 77 }

</bundles_post_ra>
